<compile_context>
chip_gen: v7x
topology: tpu7x:2x2x1
jax: 0.10.0
libtpu: 0.0.40
codegen_flags: <defaults>
</compile_context>

<pallas_src>
import jax
import jax.numpy as jnp
from jax.experimental import pallas as pl
from jax.experimental.pallas import tpu as pltpu


def _et_loss_kernel(probs_ref, targets_ref, out_ref):
    # TODO(synk): the docstring's decoder + CER (edit distance over decoded
    # strings) is host-side, data-dependent string processing with no clean
    # Pallas equivalent; the executed reference semantics are just `return 3`.
    del probs_ref, targets_ref  # dead inputs, exactly like the reference forward
    out_ref[0] = jnp.int32(3)


def et_loss(probs, targets):
    """Pallas-backed ETLoss.forward: returns the scalar int32 value 3."""
    out = pl.pallas_call(
        _et_loss_kernel,
        out_shape=jax.ShapeDtypeStruct((1,), jnp.int32),
        in_specs=[
            # Leave both inputs in place (HBM) — no auto-DMA, no VMEM footprint.
            pl.BlockSpec(memory_space=pl.ANY),  # probs   (T, N, C), never read
            pl.BlockSpec(memory_space=pl.ANY),  # targets (N, S),    never read
        ],
        out_specs=pl.BlockSpec(memory_space=pltpu.MemorySpace.SMEM),
        cost_estimate=pl.CostEstimate(flops=0, transcendentals=0, bytes_accessed=0),
    )(probs, targets)
    # Single cheap scalar extraction (folds into the surrounding XLA program).
    return out[0]


if __name__ == "__main__":
    key = jax.random.PRNGKey(0)
    k_probs, k_tgts = jax.random.split(key)

    T, N, C, S = 16, 2, 8, 8  # time, batch, classes, target length
    logits = jax.random.normal(k_probs, (T, N, C), dtype=jnp.float32)
    probs = jax.nn.log_softmax(logits, axis=-1)
    targets = jax.random.randint(k_tgts, (N, S), minval=1, maxval=C, dtype=jnp.int32)

    result = et_loss(probs, targets)
    jax.block_until_ready(result)

    assert int(result) == 3, f"expected 3, got {result}"
    print("KERNEL_OK")
</pallas_src>

<mosaic_0001>
module attributes {stable_mosaic.version = 11 : i64} {
  func.func @_et_loss_kernel(%arg0: memref<16x2x8xf32, #tpu.memory_space<any>>, %arg1: memref<2x8xi32, #tpu.memory_space<any>>, %arg2: memref<1xi32, #tpu.memory_space<smem>>) attributes {dimension_semantics = [], scalar_prefetch = 0 : i64, scratch_operands = 0 : i64, tpu.core_type = #tpu.core_type<tc>} {
    %c3_i32 = arith.constant 3 : i32
    %c0 = arith.constant 0 : index
    %0 = memref.load %arg2[%c0] : memref<1xi32, #tpu.memory_space<smem>>
    memref.store %c3_i32, %arg2[%c0] : memref<1xi32, #tpu.memory_space<smem>>
    return
  }
}

</mosaic_0001>

<bundles_post_ra>
// kernel: tpu_custom_call.1
= control target key start
LH: loop header
LB: loop body
LE: loop exit
PB: predicated region body
PF: predicated region fallthrough
CT: control target
= control target key end

     0   :  { %7 = vsyncpa [#allocation3], 0  ;;  %s37_s9 = smov 3   ;;  %s66_s0 = inlined_call_operand.vmem [shape: f32[16,2,8], index: 0, kind: input, shape index: {}]   ;;  %s67_s1 = inlined_call_operand.vmem [shape: s32[2,8], index: 1, kind: input, shape index: {}]   ;;  %s68_s2 = inlined_call_operand.hbm [shape: s32[1], index: 2, kind: output, shape index: {}]  }
   0x1   :  { %9 = sst [smem:[#allocation2]] %s37_s9  ;;  %s25_s12 = scalar_lea.hbm %s68_s2, 16 }
   0x2   :  { %p26_p0 = scmp.ne.s32.totalorder %s68_s2, %s25_s12  ;;  %p29_p1 = scmp.lt.u32.totalorder %s25_s12, %s68_s2 }
   0x4   :  { %p31_p2 = pnand %p29_p1, %p26_p0 }
   0x6   :  { %34 = shalt.err (!%p31_p2)
}
   0x7   :  { %s38_s0 = smov [#allocation2]  }
   0x8   :  { %17 = dma.smem_to_hbm %s38_s0, 16, %s68_s2, [#allocation3]  }
   0x9   :  { %35 = dma.done.wait [#allocation3], 16  }
   0xa   :  { %36 = vsyncadd [#allocation3], 4294967280 }
   0xb   :  { %21 = sfence }
   0xc   :  { %22 = vsyncpa [#allocation3], 1 }

</bundles_post_ra>
